<compile_context>
chip_gen: v6e
topology: v6e:2x2x1
jax: 0.10.0
libtpu: 0.0.40
codegen_flags: <defaults>
</compile_context>

<pallas_src>
import functools

import jax
import jax.numpy as jnp
from jax import lax
from jax.experimental import pallas as pl
from jax.experimental.pallas import tpu as pltpu

NUM_SPEC = 4          # BOWModule.num_spec
PAD_BIAS = -1e9       # bias for padded vocab columns (exp underflows to 0)


def _round_up(x, m):
    return (x + m - 1) // m * m


def _vmem_capacity_bytes():
    try:
        cap = getattr(pltpu.get_tpu_info(), "vmem_capacity_bytes", None)
        if cap:
            return int(cap)
    except Exception:
        pass
    return 64 << 20   # conservative (v7x-sized) fallback


def _pick_block_v(V, D, itemsize, num_splits, vmem_budget):
    """Largest multiple of 128 such that one weight buffer is ~<=4 MiB, two
    buffers stay well inside the VMEM budget, and small vocabs aren't
    over-padded past their per-split share."""
    row_bytes = max(D * itemsize, 1)
    bv = max(128, ((4 << 20) // row_bytes) // 128 * 128)                  # ~4 MiB / buffer
    bv = min(bv, max(128, ((vmem_budget // 4) // row_bytes) // 128 * 128))
    v128 = _round_up(V, 128)
    per_split = _round_up(-(-v128 // num_splits), 128)
    return int(max(128, min(bv, per_split)))


def _bow_kernel(nv_per, v_real, v_pad, label_smoothing,
                x_ref, w_ref, b_ref, other_ref,
                logits_ref, tgt_ref, m_ref, l_ref, a_ref, s_ref, c_ref):
    i = pl.program_id(0)            # V-split (parallel; one per TC on v7x)
    j = pl.program_id(1)            # vocab tile within the split (arbitrary)
    TV = w_ref.shape[0]
    B_pad = x_ref.shape[0]
    S = other_ref.shape[1]

    # Per-split partial outputs are VMEM-resident across j (same block index),
    # so they double as accumulators (no scratch needed).
    @pl.when(j == 0)
    def _():
        m_ref[...] = jnp.full(m_ref.shape, -jnp.inf, m_ref.dtype)
        l_ref[...] = jnp.zeros(l_ref.shape, l_ref.dtype)
        a_ref[...] = jnp.zeros(a_ref.shape, a_ref.dtype)
        s_ref[...] = jnp.zeros(s_ref.shape, s_ref.dtype)
        c_ref[...] = jnp.zeros(c_ref.shape, c_ref.dtype)

    tile = i * nv_per + j
    col_off = pl.multiple_of(tile * TV, TV)          # element offset into V_pad

    # ---- voc_linear tile: logits = x @ W_tile^T + b_tile (torch-layout W) ----
    logits = lax.dot_general(x_ref[...], w_ref[...], (((1,), (1,)), ((), ())),
                             preferred_element_type=jnp.float32)
    logits = logits + b_ref[:, pl.ds(col_off, TV)]   # (B_pad, TV)

    # ---- bag-of-words target tile, tile-local coordinates (no (B,S,V)) ----
    other_loc = other_ref[...] - col_off             # (B_pad, S) int32
    col = lax.broadcasted_iota(jnp.int32, (B_pad, TV), 1)
    hit = jnp.zeros((B_pad, TV), dtype=jnp.bool_)
    for s in range(S):                               # small & static -> unrolled
        hit = jnp.logical_or(hit, other_loc[:, s:s + 1] == col)
    tgt_f = hit.astype(jnp.float32)

    # TODO(synk): emit tgt as int8 (or skip it) when callers only need the loss.
    tgt_ref[...] = tgt_f
    logits_ref[...] = logits                         # lse subtracted in wrapper

    # ---- online log-sum-exp over this split's vocab stripe ----
    m_prev = m_ref[...]
    m_new = jnp.maximum(m_prev, jnp.max(logits, axis=1, keepdims=True))
    l_ref[...] = (l_ref[...] * jnp.exp(m_prev - m_new)
                  + jnp.sum(jnp.exp(logits - m_new), axis=1, keepdims=True))
    m_ref[...] = m_new

    # ---- loss partial sums ----
    a_ref[...] += jnp.sum(jnp.where(hit, logits, 0.0), axis=1, keepdims=True)
    c_ref[...] += jnp.sum(tgt_f, axis=1, keepdims=True)
    if label_smoothing != 0.0:                       # static python check
        if v_pad > v_real:                           # mask padded columns
            valid = (col + col_off) < v_real
            s_tile = jnp.where(valid, logits, 0.0)
        else:
            s_tile = logits
        s_ref[...] += jnp.sum(s_tile, axis=1, keepdims=True)


def bow_forward(last_hidden_state_cls, weight, bias, other_sentence, *,
                factor=1.0, label_smoothing=0.0,
                weight_dtype=jnp.bfloat16, block_v=None, num_splits=None):
    """x: (B, D); weight: (V, D) torch layout (NOT transposed); bias: (V,);
    other_sentence: (B, S) int token ids in [0, V + NUM_SPEC)."""
    x = last_hidden_state_cls
    B, D = x.shape
    V = weight.shape[0]
    S = other_sentence.shape[1]

    compute_dtype = jnp.dtype(jnp.float32) if weight_dtype is None else jnp.dtype(weight_dtype)
    itemsize = compute_dtype.itemsize

    vmem_budget = int(_vmem_capacity_bytes() * 0.70)   # ~44 MiB v7x, ~90 MiB v5e/v6e

    if num_splits is None:
        # 2 keeps both v7x TensorCores streaming weights; harmless on 1-TC chips.
        num_splits = 2 if _round_up(V, 128) >= 256 else 1
    if block_v is None:
        block_v = _pick_block_v(V, D, itemsize, num_splits, vmem_budget)
    block_v = max(128, _round_up(int(block_v), 128))

    V_pad = _round_up(V, num_splits * block_v)
    nv_per = V_pad // (num_splits * block_v)
    B_pad = _round_up(B, 8)

    # ---- pad / cast operands once in the wrapper ----
    w_p = jnp.pad(weight.astype(compute_dtype), ((0, V_pad - V), (0, 0)))
    b_p = jnp.pad(bias.astype(jnp.float32), (0, V_pad - V),
                  constant_values=PAD_BIAS).reshape(1, V_pad)
    x_p = jnp.pad(x.astype(compute_dtype), ((0, B_pad - B), (0, 0)))
    other_p = jnp.pad(other_sentence.astype(jnp.int32) - NUM_SPEC,
                      ((0, B_pad - B), (0, 0)), constant_values=-1)

    # ---- VMEM accounting from actual residents ----
    vmem_est = (2 * block_v * D * itemsize            # double-buffered weight tiles
                + 2 * 2 * B_pad * block_v * 4         # logits + tgt output tiles
                + 2 * V_pad * 4                       # resident bias
                + 2 * B_pad * D * itemsize            # resident x
                + 2 * B_pad * S * 4                   # resident token ids
                + 5 * 2 * 8 * 128 * 4                 # tiny per-split partials
                + (1 << 20))                          # slack
    vmem_limit = int(min(max(2 * vmem_est, 16 << 20), vmem_budget))

    kernel = functools.partial(_bow_kernel, nv_per, V, V_pad, float(label_smoothing))
    tile_idx = lambda i, j: (0, i * nv_per + j)
    part_shape = jax.ShapeDtypeStruct((num_splits, B_pad, 1), jnp.float32)

    def part_spec():
        return pl.BlockSpec((None, B_pad, 1), lambda i, j: (i, 0, 0))

    outs = pl.pallas_call(
        kernel,
        out_shape=(
            jax.ShapeDtypeStruct((B_pad, V_pad), jnp.float32),   # raw logits
            jax.ShapeDtypeStruct((B_pad, V_pad), jnp.float32),   # bow target (0/1)
            part_shape, part_shape, part_shape, part_shape, part_shape,  # m,l,a,s,c
        ),
        grid_spec=pltpu.PrefetchScalarGridSpec(
            num_scalar_prefetch=0,
            grid=(num_splits, nv_per),
            in_specs=[
                pl.BlockSpec((B_pad, D), lambda i, j: (0, 0)),              # x (resident)
                pl.BlockSpec((block_v, D), lambda i, j: (i * nv_per + j, 0)),  # weight tiles
                pl.BlockSpec((1, V_pad), lambda i, j: (0, 0)),              # bias (resident)
                pl.BlockSpec((B_pad, S), lambda i, j: (0, 0)),              # token ids (resident)
            ],
            out_specs=(
                pl.BlockSpec((B_pad, block_v), tile_idx),                   # logits tile
                pl.BlockSpec((B_pad, block_v), tile_idx),                   # target tile
                part_spec(), part_spec(), part_spec(), part_spec(), part_spec(),
            ),
        ),
        compiler_params=pltpu.CompilerParams(
            dimension_semantics=("parallel", "arbitrary"),
            vmem_limit_bytes=vmem_limit),
    )(x_p, w_p, b_p, other_p)

    logits, tgt, m_p, l_p, a_p, s_p, c_p = outs

    # ---- combine per-split partials (tiny, B-sized wrapper epilogue) ----
    m_p = m_p[..., 0]                                       # (NS, B_pad)
    l_p = l_p[..., 0]
    m_tot = jnp.max(m_p, axis=0)                            # (B_pad,)
    l_tot = jnp.sum(l_p * jnp.exp(m_p - m_tot[None, :]), axis=0)
    lse = m_tot + jnp.log(l_tot)                            # (B_pad,)

    logprobs = logits[:B, :V] - lse[:B, None]

    a_tot = jnp.sum(a_p[..., 0], axis=0)[:B]
    s_tot = jnp.sum(s_p[..., 0], axis=0)[:B]
    c_tot = jnp.sum(c_p[..., 0], axis=0)[:B]
    ls = float(label_smoothing)
    denom = jnp.maximum(c_tot, 1.0)
    ind = jnp.minimum(c_tot, 1.0)                           # 1 if any positive else 0
    sum_p = (1.0 - ls) * ind + ls
    sum_p_logits = (1.0 - ls) / denom * a_tot + (ls / V) * s_tot
    per_ex = lse[:B] * sum_p - sum_p_logits                 # -sum_v p*logprob
    loss = float(factor) * jnp.mean(per_ex)

    return dict(loss=loss, logprobs=logprobs, target=tgt[:B, :V].astype(jnp.bool_))


def _bow_reference(x, weight, bias, other, *, factor, label_smoothing,
                   num_spec=NUM_SPEC):
    """Pure-JAX reference mirroring the PyTorch module (same loss assumption)."""
    B = x.shape[0]
    V = weight.shape[0]
    logits = jnp.dot(x, weight.T, precision=lax.Precision.HIGHEST) + bias
    logprobs = jax.nn.log_softmax(logits, axis=1)
    one_hot = jnp.zeros((B, V + num_spec), jnp.bool_)
    one_hot = one_hot.at[jnp.arange(B)[:, None], other].set(True)
    tgt = one_hot[:, num_spec:]
    tf = tgt.astype(jnp.float32)
    cnt = tf.sum(axis=1, keepdims=True)
    p = (1.0 - label_smoothing) * tf / jnp.maximum(cnt, 1.0) + label_smoothing / V
    per_ex = -(p * logprobs).sum(axis=1)
    return dict(loss=factor * per_ex.mean(), logprobs=logprobs, target=tgt)


if __name__ == "__main__":
    # V=300 (not a 128 multiple) exercises the vocab-padding/masking path;
    # block_v=128 + num_splits=2 exercises both the per-split online-LSE
    # accumulation (2 tiles per split) and the cross-split combine.
    B, D, V, S = 2, 32, 300, 8
    factor = 1.0
    label_smoothing = 0.1
    bow_multiplicator = 1.0

    key = jax.random.PRNGKey(0)
    kx, kw, kb, ks = jax.random.split(key, 4)

    bound = 1.0 / jnp.sqrt(jnp.float32(D))
    weight = jax.random.uniform(kw, (V, D), jnp.float32, -bound, bound)
    weight = weight * bow_multiplicator
    bias = jax.random.uniform(kb, (V,), jnp.float32, -bound, bound)
    x = jax.random.normal(kx, (B, D), jnp.float32)          # last_hidden_state_cls
    other_sentence = jax.random.randint(ks, (B, S), 0, V + NUM_SPEC)

    ref = _bow_reference(x, weight, bias, other_sentence,
                         factor=factor, label_smoothing=label_smoothing)

    # 1) exact-parity path (f32 weight streaming), small tiles.
    out32 = bow_forward(x, weight, bias, other_sentence,
                        factor=factor, label_smoothing=label_smoothing,
                        weight_dtype=jnp.float32, block_v=128)
    jax.block_until_ready(out32)
    assert out32["logprobs"].shape == (B, V)
    assert out32["target"].shape == (B, V)
    assert out32["loss"].shape == ()
    assert bool(jnp.array_equal(out32["target"], ref["target"]))
    assert bool(jnp.allclose(out32["logprobs"], ref["logprobs"], rtol=1e-4, atol=1e-4))
    assert bool(jnp.allclose(out32["loss"], ref["loss"], rtol=1e-4, atol=1e-4))

    # 2) perf-default path (bf16 weight streaming, auto block_v) -> loose tol.
    out16 = bow_forward(x, weight, bias, other_sentence,
                        factor=factor, label_smoothing=label_smoothing)
    jax.block_until_ready(out16)
    assert bool(jnp.array_equal(out16["target"], ref["target"]))
    assert bool(jnp.allclose(out16["logprobs"], ref["logprobs"], rtol=5e-2, atol=5e-2))
    assert bool(jnp.allclose(out16["loss"], ref["loss"], rtol=5e-2, atol=5e-2))

    print("KERNEL_OK")
</pallas_src>

<mosaic_0001>
module attributes {stable_mosaic.version = 11 : i64} {
  func.func @_bow_kernel(%arg0: i32, %arg1: i32, %arg2: memref<8x32xf32, #tpu.memory_space<vmem>>, %arg3: memref<128x32xf32, #tpu.memory_space<vmem>>, %arg4: memref<1x512xf32, #tpu.memory_space<vmem>>, %arg5: memref<8x8xi32, #tpu.memory_space<vmem>>, %arg6: memref<8x128xf32, #tpu.memory_space<vmem>>, %arg7: memref<8x128xf32, #tpu.memory_space<vmem>>, %arg8: memref<1x8x1xf32, #tpu.memory_space<vmem>>, %arg9: memref<1x8x1xf32, #tpu.memory_space<vmem>>, %arg10: memref<1x8x1xf32, #tpu.memory_space<vmem>>, %arg11: memref<1x8x1xf32, #tpu.memory_space<vmem>>, %arg12: memref<1x8x1xf32, #tpu.memory_space<vmem>>) attributes {dimension_semantics = [#tpu.dimension_semantics<parallel>, #tpu.dimension_semantics<arbitrary>], iteration_bounds = array<i64: 2, 2>, scalar_prefetch = 0 : i64, scratch_operands = 0 : i64, tpu.core_type = #tpu.core_type<tc>, window_params = [{pipeline_mode = #tpu.pipeline_mode<synchronous>, transform_indices = @transform_0, window_bounds = array<i64: 8, 32>}, {transform_indices = @transform_1, window_bounds = array<i64: 128, 32>}, {pipeline_mode = #tpu.pipeline_mode<synchronous>, transform_indices = @transform_2, window_bounds = array<i64: 1, 512>}, {pipeline_mode = #tpu.pipeline_mode<synchronous>, transform_indices = @transform_3, window_bounds = array<i64: 8, 8>}, {transform_indices = @transform_4, window_bounds = array<i64: 8, 128>}, {transform_indices = @transform_5, window_bounds = array<i64: 8, 128>}, {transform_indices = @transform_6, window_bounds = array<i64: 1, 8, 1>}, {transform_indices = @transform_7, window_bounds = array<i64: 1, 8, 1>}, {transform_indices = @transform_8, window_bounds = array<i64: 1, 8, 1>}, {transform_indices = @transform_9, window_bounds = array<i64: 1, 8, 1>}, {transform_indices = @transform_10, window_bounds = array<i64: 1, 8, 1>}]} {
    %c0_i32 = arith.constant 0 : i32
    %0 = arith.cmpi eq, %arg1, %c0_i32 : i32
    %1 = arith.extui %0 : i1 to i32
    %c0_i32_0 = arith.constant 0 : i32
    %2 = arith.cmpi ne, %1, %c0_i32_0 : i32
    scf.if %2 {
      %cst_48 = arith.constant 0xFF800000 : f32
      %109 = vector.broadcast %cst_48 : f32 to vector<8x1xf32>
      %c0_49 = arith.constant 0 : index
      %c0_50 = arith.constant 0 : index
      %c0_51 = arith.constant 0 : index
      %110 = vector.load %arg8[%c0_49, %c0_50, %c0_51] : memref<1x8x1xf32, #tpu.memory_space<vmem>>, vector<1x8x1xf32>
      %111 = vector.shape_cast %110 : vector<1x8x1xf32> to vector<8x1xf32>
      %112 = vector.shape_cast %109 : vector<8x1xf32> to vector<1x8x1xf32>
      tpu.vector_store %arg8[%c0_49, %c0_50, %c0_51], %112 {strides = array<i32>} : memref<1x8x1xf32, #tpu.memory_space<vmem>>, vector<1x8x1xf32>,
      %cst_52 = arith.constant 0.000000e+00 : f32
      %113 = vector.broadcast %cst_52 : f32 to vector<8x1xf32>
      %c0_53 = arith.constant 0 : index
      %c0_54 = arith.constant 0 : index
      %c0_55 = arith.constant 0 : index
      %114 = vector.load %arg9[%c0_53, %c0_54, %c0_55] : memref<1x8x1xf32, #tpu.memory_space<vmem>>, vector<1x8x1xf32>
      %115 = vector.shape_cast %114 : vector<1x8x1xf32> to vector<8x1xf32>
      %116 = vector.shape_cast %113 : vector<8x1xf32> to vector<1x8x1xf32>
      tpu.vector_store %arg9[%c0_53, %c0_54, %c0_55], %116 {strides = array<i32>} : memref<1x8x1xf32, #tpu.memory_space<vmem>>, vector<1x8x1xf32>,
      %cst_56 = arith.constant 0.000000e+00 : f32
      %117 = vector.broadcast %cst_56 : f32 to vector<8x1xf32>
      %c0_57 = arith.constant 0 : index
      %c0_58 = arith.constant 0 : index
      %c0_59 = arith.constant 0 : index
      %118 = vector.load %arg10[%c0_57, %c0_58, %c0_59] : memref<1x8x1xf32, #tpu.memory_space<vmem>>, vector<1x8x1xf32>
      %119 = vector.shape_cast %118 : vector<1x8x1xf32> to vector<8x1xf32>
      %120 = vector.shape_cast %117 : vector<8x1xf32> to vector<1x8x1xf32>
      tpu.vector_store %arg10[%c0_57, %c0_58, %c0_59], %120 {strides = array<i32>} : memref<1x8x1xf32, #tpu.memory_space<vmem>>, vector<1x8x1xf32>,
      %cst_60 = arith.constant 0.000000e+00 : f32
      %121 = vector.broadcast %cst_60 : f32 to vector<8x1xf32>
      %c0_61 = arith.constant 0 : index
      %c0_62 = arith.constant 0 : index
      %c0_63 = arith.constant 0 : index
      %122 = vector.load %arg11[%c0_61, %c0_62, %c0_63] : memref<1x8x1xf32, #tpu.memory_space<vmem>>, vector<1x8x1xf32>
      %123 = vector.shape_cast %122 : vector<1x8x1xf32> to vector<8x1xf32>
      %124 = vector.shape_cast %121 : vector<8x1xf32> to vector<1x8x1xf32>
      tpu.vector_store %arg11[%c0_61, %c0_62, %c0_63], %124 {strides = array<i32>} : memref<1x8x1xf32, #tpu.memory_space<vmem>>, vector<1x8x1xf32>,
      %cst_64 = arith.constant 0.000000e+00 : f32
      %125 = vector.broadcast %cst_64 : f32 to vector<8x1xf32>
      %c0_65 = arith.constant 0 : index
      %c0_66 = arith.constant 0 : index
      %c0_67 = arith.constant 0 : index
      %126 = vector.load %arg12[%c0_65, %c0_66, %c0_67] : memref<1x8x1xf32, #tpu.memory_space<vmem>>, vector<1x8x1xf32>
      %127 = vector.shape_cast %126 : vector<1x8x1xf32> to vector<8x1xf32>
      %128 = vector.shape_cast %125 : vector<8x1xf32> to vector<1x8x1xf32>
      tpu.vector_store %arg12[%c0_65, %c0_66, %c0_67], %128 {strides = array<i32>} : memref<1x8x1xf32, #tpu.memory_space<vmem>>, vector<1x8x1xf32>,
    } else {
    }
    %c2_i32 = arith.constant 2 : i32
    %3 = arith.muli %arg0, %c2_i32 : i32
    %4 = arith.addi %3, %arg1 : i32
    %c128_i32 = arith.constant 128 : i32
    %5 = arith.muli %4, %c128_i32 : i32
    %6 = tpu.assume_multiple %5, 128 : i32
    %c0 = arith.constant 0 : index
    %c0_1 = arith.constant 0 : index
    %7 = vector.load %arg2[%c0, %c0_1] : memref<8x32xf32, #tpu.memory_space<vmem>>, vector<8x32xf32>
    %c0_2 = arith.constant 0 : index
    %c0_3 = arith.constant 0 : index
    %8 = vector.load %arg3[%c0_2, %c0_3] : memref<128x32xf32, #tpu.memory_space<vmem>>, vector<128x32xf32>
    %cst = arith.constant dense<0.000000e+00> : vector<8x128xf32>
    %9 = tpu.matmul %7, %8, %cst {dimension_numbers = #tpu.dot_dimension_numbers<[1], [1], [0], [0], [0, 0, 1, 0], [], []>} : vector<8x32xf32>, vector<128x32xf32>, vector<8x128xf32> -> vector<8x128xf32>
    %c0_4 = arith.constant 0 : index
    %10 = arith.index_cast %6 : i32 to index
    %11 = vector.load %arg4[%c0_4, %10] : memref<1x512xf32, #tpu.memory_space<vmem>>, vector<1x128xf32>
    %12 = vector.broadcast %11 : vector<1x128xf32> to vector<8x128xf32>
    %13 = arith.addf %9, %12 : vector<8x128xf32>
    %c0_5 = arith.constant 0 : index
    %c0_6 = arith.constant 0 : index
    %14 = vector.load %arg5[%c0_5, %c0_6] : memref<8x8xi32, #tpu.memory_space<vmem>>, vector<8x8xi32>
    %15 = vector.broadcast %6 : i32 to vector<8x8xi32>
    %16 = arith.subi %14, %15 : vector<8x8xi32>
    %17 = tpu.iota {dimensions = array<i32: 1>} : vector<8x128xi32>
    %false = arith.constant false
    %18 = vector.broadcast %false : i1 to vector<8x128xi1>
    %19 = vector.extract_strided_slice %16 {offsets = [0, 0], sizes = [8, 1], strides = [1, 1]} : vector<8x8xi32> to vector<8x1xi32>
    %20 = vector.broadcast %19 : vector<8x1xi32> to vector<8x128xi32>
    %21 = arith.cmpi eq, %20, %17 : vector<8x128xi32>
    %22 = arith.ori %18, %21 : vector<8x128xi1>
    %23 = vector.extract_strided_slice %16 {offsets = [0, 1], sizes = [8, 1], strides = [1, 1]} : vector<8x8xi32> to vector<8x1xi32>
    %24 = vector.broadcast %23 : vector<8x1xi32> to vector<8x128xi32>
    %25 = arith.cmpi eq, %24, %17 : vector<8x128xi32>
    %26 = arith.ori %22, %25 : vector<8x128xi1>
    %27 = vector.extract_strided_slice %16 {offsets = [0, 2], sizes = [8, 1], strides = [1, 1]} : vector<8x8xi32> to vector<8x1xi32>
    %28 = vector.broadcast %27 : vector<8x1xi32> to vector<8x128xi32>
    %29 = arith.cmpi eq, %28, %17 : vector<8x128xi32>
    %30 = arith.ori %26, %29 : vector<8x128xi1>
    %31 = vector.extract_strided_slice %16 {offsets = [0, 3], sizes = [8, 1], strides = [1, 1]} : vector<8x8xi32> to vector<8x1xi32>
    %32 = vector.broadcast %31 : vector<8x1xi32> to vector<8x128xi32>
    %33 = arith.cmpi eq, %32, %17 : vector<8x128xi32>
    %34 = arith.ori %30, %33 : vector<8x128xi1>
    %35 = vector.extract_strided_slice %16 {offsets = [0, 4], sizes = [8, 1], strides = [1, 1]} : vector<8x8xi32> to vector<8x1xi32>
    %36 = vector.broadcast %35 : vector<8x1xi32> to vector<8x128xi32>
    %37 = arith.cmpi eq, %36, %17 : vector<8x128xi32>
    %38 = arith.ori %34, %37 : vector<8x128xi1>
    %39 = vector.extract_strided_slice %16 {offsets = [0, 5], sizes = [8, 1], strides = [1, 1]} : vector<8x8xi32> to vector<8x1xi32>
    %40 = vector.broadcast %39 : vector<8x1xi32> to vector<8x128xi32>
    %41 = arith.cmpi eq, %40, %17 : vector<8x128xi32>
    %42 = arith.ori %38, %41 : vector<8x128xi1>
    %43 = vector.extract_strided_slice %16 {offsets = [0, 6], sizes = [8, 1], strides = [1, 1]} : vector<8x8xi32> to vector<8x1xi32>
    %44 = vector.broadcast %43 : vector<8x1xi32> to vector<8x128xi32>
    %45 = arith.cmpi eq, %44, %17 : vector<8x128xi32>
    %46 = arith.ori %42, %45 : vector<8x128xi1>
    %47 = vector.extract_strided_slice %16 {offsets = [0, 7], sizes = [8, 1], strides = [1, 1]} : vector<8x8xi32> to vector<8x1xi32>
    %48 = vector.broadcast %47 : vector<8x1xi32> to vector<8x128xi32>
    %49 = arith.cmpi eq, %48, %17 : vector<8x128xi32>
    %50 = arith.ori %46, %49 : vector<8x128xi1>
    %51 = arith.extui %50 : vector<8x128xi1> to vector<8x128xi32>
    %52 = arith.sitofp %51 : vector<8x128xi32> to vector<8x128xf32>
    %c0_7 = arith.constant 0 : index
    %c0_8 = arith.constant 0 : index
    %53 = vector.load %arg7[%c0_7, %c0_8] : memref<8x128xf32, #tpu.memory_space<vmem>>, vector<8x128xf32>
    tpu.vector_store %arg7[%c0_7, %c0_8], %52 {strides = array<i32>} : memref<8x128xf32, #tpu.memory_space<vmem>>, vector<8x128xf32>,
    %c0_9 = arith.constant 0 : index
    %c0_10 = arith.constant 0 : index
    %54 = vector.load %arg6[%c0_9, %c0_10] : memref<8x128xf32, #tpu.memory_space<vmem>>, vector<8x128xf32>
    tpu.vector_store %arg6[%c0_9, %c0_10], %13 {strides = array<i32>} : memref<8x128xf32, #tpu.memory_space<vmem>>, vector<8x128xf32>,
    %c0_11 = arith.constant 0 : index
    %c0_12 = arith.constant 0 : index
    %c0_13 = arith.constant 0 : index
    %55 = vector.load %arg8[%c0_11, %c0_12, %c0_13] : memref<1x8x1xf32, #tpu.memory_space<vmem>>, vector<1x8x1xf32>
    %56 = vector.shape_cast %55 : vector<1x8x1xf32> to vector<8x1xf32>
    %cst_14 = arith.constant dense<0xFF800000> : vector<8xf32>
    %57 = vector.multi_reduction <maximumf>, %13, %cst_14 [1] : vector<8x128xf32> to vector<8xf32>
    %58 = vector.shape_cast %57 : vector<8xf32> to vector<8x1xf32>
    %59 = arith.maximumf %56, %58 : vector<8x1xf32>
    %c0_15 = arith.constant 0 : index
    %c0_16 = arith.constant 0 : index
    %c0_17 = arith.constant 0 : index
    %60 = vector.load %arg9[%c0_15, %c0_16, %c0_17] : memref<1x8x1xf32, #tpu.memory_space<vmem>>, vector<1x8x1xf32>
    %61 = vector.shape_cast %60 : vector<1x8x1xf32> to vector<8x1xf32>
    %62 = arith.subf %56, %59 : vector<8x1xf32>
    %63 = math.exp %62 : vector<8x1xf32>
    %64 = arith.mulf %61, %63 : vector<8x1xf32>
    %65 = vector.broadcast %59 : vector<8x1xf32> to vector<8x128xf32>
    %66 = arith.subf %13, %65 : vector<8x128xf32>
    %67 = math.exp %66 : vector<8x128xf32>
    %cst_18 = arith.constant dense<0.000000e+00> : vector<8xf32>
    %68 = vector.multi_reduction <add>, %67, %cst_18 [1] : vector<8x128xf32> to vector<8xf32>
    %69 = vector.shape_cast %68 : vector<8xf32> to vector<8x1xf32>
    %70 = arith.addf %64, %69 : vector<8x1xf32>
    %c0_19 = arith.constant 0 : index
    %c0_20 = arith.constant 0 : index
    %c0_21 = arith.constant 0 : index
    %71 = vector.load %arg9[%c0_19, %c0_20, %c0_21] : memref<1x8x1xf32, #tpu.memory_space<vmem>>, vector<1x8x1xf32>
    %72 = vector.shape_cast %71 : vector<1x8x1xf32> to vector<8x1xf32>
    %73 = vector.shape_cast %70 : vector<8x1xf32> to vector<1x8x1xf32>
    tpu.vector_store %arg9[%c0_19, %c0_20, %c0_21], %73 {strides = array<i32>} : memref<1x8x1xf32, #tpu.memory_space<vmem>>, vector<1x8x1xf32>,
    %c0_22 = arith.constant 0 : index
    %c0_23 = arith.constant 0 : index
    %c0_24 = arith.constant 0 : index
    %74 = vector.load %arg8[%c0_22, %c0_23, %c0_24] : memref<1x8x1xf32, #tpu.memory_space<vmem>>, vector<1x8x1xf32>
    %75 = vector.shape_cast %74 : vector<1x8x1xf32> to vector<8x1xf32>
    %76 = vector.shape_cast %59 : vector<8x1xf32> to vector<1x8x1xf32>
    tpu.vector_store %arg8[%c0_22, %c0_23, %c0_24], %76 {strides = array<i32>} : memref<1x8x1xf32, #tpu.memory_space<vmem>>, vector<1x8x1xf32>,
    %c0_25 = arith.constant 0 : index
    %c0_26 = arith.constant 0 : index
    %c0_27 = arith.constant 0 : index
    %77 = vector.load %arg10[%c0_25, %c0_26, %c0_27] : memref<1x8x1xf32, #tpu.memory_space<vmem>>, vector<1x8x1xf32>
    %78 = vector.shape_cast %77 : vector<1x8x1xf32> to vector<8x1xf32>
    %cst_28 = arith.constant 0.000000e+00 : f32
    %79 = vector.broadcast %cst_28 : f32 to vector<8x128xf32>
    %80 = arith.select %50, %13, %79 : vector<8x128xi1>, vector<8x128xf32>
    %cst_29 = arith.constant dense<0.000000e+00> : vector<8xf32>
    %81 = vector.multi_reduction <add>, %80, %cst_29 [1] : vector<8x128xf32> to vector<8xf32>
    %82 = vector.shape_cast %81 : vector<8xf32> to vector<8x1xf32>
    %83 = arith.addf %78, %82 : vector<8x1xf32>
    %c0_30 = arith.constant 0 : index
    %c0_31 = arith.constant 0 : index
    %c0_32 = arith.constant 0 : index
    %84 = vector.load %arg10[%c0_30, %c0_31, %c0_32] : memref<1x8x1xf32, #tpu.memory_space<vmem>>, vector<1x8x1xf32>
    %85 = vector.shape_cast %84 : vector<1x8x1xf32> to vector<8x1xf32>
    %86 = vector.shape_cast %83 : vector<8x1xf32> to vector<1x8x1xf32>
    tpu.vector_store %arg10[%c0_30, %c0_31, %c0_32], %86 {strides = array<i32>} : memref<1x8x1xf32, #tpu.memory_space<vmem>>, vector<1x8x1xf32>,
    %c0_33 = arith.constant 0 : index
    %c0_34 = arith.constant 0 : index
    %c0_35 = arith.constant 0 : index
    %87 = vector.load %arg12[%c0_33, %c0_34, %c0_35] : memref<1x8x1xf32, #tpu.memory_space<vmem>>, vector<1x8x1xf32>
    %88 = vector.shape_cast %87 : vector<1x8x1xf32> to vector<8x1xf32>
    %cst_36 = arith.constant dense<0.000000e+00> : vector<8xf32>
    %89 = vector.multi_reduction <add>, %52, %cst_36 [1] : vector<8x128xf32> to vector<8xf32>
    %90 = vector.shape_cast %89 : vector<8xf32> to vector<8x1xf32>
    %91 = arith.addf %88, %90 : vector<8x1xf32>
    %c0_37 = arith.constant 0 : index
    %c0_38 = arith.constant 0 : index
    %c0_39 = arith.constant 0 : index
    %92 = vector.load %arg12[%c0_37, %c0_38, %c0_39] : memref<1x8x1xf32, #tpu.memory_space<vmem>>, vector<1x8x1xf32>
    %93 = vector.shape_cast %92 : vector<1x8x1xf32> to vector<8x1xf32>
    %94 = vector.shape_cast %91 : vector<8x1xf32> to vector<1x8x1xf32>
    tpu.vector_store %arg12[%c0_37, %c0_38, %c0_39], %94 {strides = array<i32>} : memref<1x8x1xf32, #tpu.memory_space<vmem>>, vector<1x8x1xf32>,
    %95 = vector.broadcast %6 : i32 to vector<8x128xi32>
    %96 = arith.addi %17, %95 : vector<8x128xi32>
    %c300_i32 = arith.constant 300 : i32
    %97 = vector.broadcast %c300_i32 : i32 to vector<8x128xi32>
    %98 = arith.cmpi slt, %96, %97 : vector<8x128xi32>
    %cst_40 = arith.constant 0.000000e+00 : f32
    %99 = vector.broadcast %cst_40 : f32 to vector<8x128xf32>
    %100 = arith.select %98, %13, %99 : vector<8x128xi1>, vector<8x128xf32>
    %c0_41 = arith.constant 0 : index
    %c0_42 = arith.constant 0 : index
    %c0_43 = arith.constant 0 : index
    %101 = vector.load %arg11[%c0_41, %c0_42, %c0_43] : memref<1x8x1xf32, #tpu.memory_space<vmem>>, vector<1x8x1xf32>
    %102 = vector.shape_cast %101 : vector<1x8x1xf32> to vector<8x1xf32>
    %cst_44 = arith.constant dense<0.000000e+00> : vector<8xf32>
    %103 = vector.multi_reduction <add>, %100, %cst_44 [1] : vector<8x128xf32> to vector<8xf32>
    %104 = vector.shape_cast %103 : vector<8xf32> to vector<8x1xf32>
    %105 = arith.addf %102, %104 : vector<8x1xf32>
    %c0_45 = arith.constant 0 : index
    %c0_46 = arith.constant 0 : index
    %c0_47 = arith.constant 0 : index
    %106 = vector.load %arg11[%c0_45, %c0_46, %c0_47] : memref<1x8x1xf32, #tpu.memory_space<vmem>>, vector<1x8x1xf32>
    %107 = vector.shape_cast %106 : vector<1x8x1xf32> to vector<8x1xf32>
    %108 = vector.shape_cast %105 : vector<8x1xf32> to vector<1x8x1xf32>
    tpu.vector_store %arg11[%c0_45, %c0_46, %c0_47], %108 {strides = array<i32>} : memref<1x8x1xf32, #tpu.memory_space<vmem>>, vector<1x8x1xf32>,
    return
  }
  func.func @transform_0(%arg0: i32, %arg1: i32) -> (i32, i32) {
    %c0_i32 = arith.constant 0 : i32
    %c0_i32_0 = arith.constant 0 : i32
    %c0_i32_1 = arith.constant 0 : i32
    return %c0_i32, %c0_i32_0 : i32, i32
  }
  func.func @transform_1(%arg0: i32, %arg1: i32) -> (i32, i32) {
    %c2_i32 = arith.constant 2 : i32
    %0 = arith.muli %arg0, %c2_i32 : i32
    %1 = arith.addi %0, %arg1 : i32
    %c0_i32 = arith.constant 0 : i32
    %c0_i32_0 = arith.constant 0 : i32
    return %1, %c0_i32 : i32, i32
  }
  func.func @transform_2(%arg0: i32, %arg1: i32) -> (i32, i32) {
    %c0_i32 = arith.constant 0 : i32
    %c0_i32_0 = arith.constant 0 : i32
    %c0_i32_1 = arith.constant 0 : i32
    return %c0_i32, %c0_i32_0 : i32, i32
  }
  func.func @transform_3(%arg0: i32, %arg1: i32) -> (i32, i32) {
    %c0_i32 = arith.constant 0 : i32
    %c0_i32_0 = arith.constant 0 : i32
    %c0_i32_1 = arith.constant 0 : i32
    return %c0_i32, %c0_i32_0 : i32, i32
  }
  func.func @transform_4(%arg0: i32, %arg1: i32) -> (i32, i32) {
    %c2_i32 = arith.constant 2 : i32
    %0 = arith.muli %arg0, %c2_i32 : i32
    %1 = arith.addi %0, %arg1 : i32
    %c0_i32 = arith.constant 0 : i32
    %c0_i32_0 = arith.constant 0 : i32
    return %c0_i32, %1 : i32, i32
  }
  func.func @transform_5(%arg0: i32, %arg1: i32) -> (i32, i32) {
    %c2_i32 = arith.constant 2 : i32
    %0 = arith.muli %arg0, %c2_i32 : i32
    %1 = arith.addi %0, %arg1 : i32
    %c0_i32 = arith.constant 0 : i32
    %c0_i32_0 = arith.constant 0 : i32
    return %c0_i32, %1 : i32, i32
  }
  func.func @transform_6(%arg0: i32, %arg1: i32) -> (i32, i32, i32) {
    %c0_i32 = arith.constant 0 : i32
    %c0_i32_0 = arith.constant 0 : i32
    %c0_i32_1 = arith.constant 0 : i32
    return %arg0, %c0_i32, %c0_i32_0 : i32, i32, i32
  }
  func.func @transform_7(%arg0: i32, %arg1: i32) -> (i32, i32, i32) {
    %c0_i32 = arith.constant 0 : i32
    %c0_i32_0 = arith.constant 0 : i32
    %c0_i32_1 = arith.constant 0 : i32
    return %arg0, %c0_i32, %c0_i32_0 : i32, i32, i32
  }
  func.func @transform_8(%arg0: i32, %arg1: i32) -> (i32, i32, i32) {
    %c0_i32 = arith.constant 0 : i32
    %c0_i32_0 = arith.constant 0 : i32
    %c0_i32_1 = arith.constant 0 : i32
    return %arg0, %c0_i32, %c0_i32_0 : i32, i32, i32
  }
  func.func @transform_9(%arg0: i32, %arg1: i32) -> (i32, i32, i32) {
    %c0_i32 = arith.constant 0 : i32
    %c0_i32_0 = arith.constant 0 : i32
    %c0_i32_1 = arith.constant 0 : i32
    return %arg0, %c0_i32, %c0_i32_0 : i32, i32, i32
  }
  func.func @transform_10(%arg0: i32, %arg1: i32) -> (i32, i32, i32) {
    %c0_i32 = arith.constant 0 : i32
    %c0_i32_0 = arith.constant 0 : i32
    %c0_i32_1 = arith.constant 0 : i32
    return %arg0, %c0_i32, %c0_i32_0 : i32, i32, i32
  }
}

</mosaic_0001>

<bundles_post_ra>
// kernel: tpu_custom_call.1
= control target key start
LH: loop header
LB: loop body
LE: loop exit
PB: predicated region body
PF: predicated region fallthrough
CT: control target
= control target key end

     0   :  { %s1692_s0 = inlined_call_operand.vmem [shape: f32[8,32], index: 0, kind: input, shape index: {}]   ;;  %s1693_s1 = inlined_call_operand.vmem [shape: f32[512,32], index: 1, kind: input, shape index: {}]   ;;  %s1694_s2 = inlined_call_operand.vmem [shape: f32[1,512], index: 2, kind: input, shape index: {}]   ;;  %s1695_s3 = inlined_call_operand.vmem [shape: s32[8,8], index: 3, kind: input, shape index: {}]   ;;  %s1696_s4 = inlined_call_operand.hbm [shape: f32[8,512], index: 4, kind: output, shape index: {0}]   ;;  %s1697_s5 = inlined_call_operand.hbm [shape: f32[8,512], index: 5, kind: output, shape index: {1}]   ;;  %s1698_s6 = inlined_call_operand.vmem [shape: f32[2,8,1], index: 6, kind: output, shape index: {2}]   ;;  %s1699_s7 = inlined_call_operand.vmem [shape: f32[2,8,1], index: 7, kind: output, shape index: {3}]   ;;  %s1700_s8 = inlined_call_operand.vmem [shape: f32[2,8,1], index: 8, kind: output, shape index: {4}]   ;;  %s1701_s9 = inlined_call_operand.vmem [shape: f32[2,8,1], index: 9, kind: output, shape index: {5}]   ;;  %s1702_s10 = inlined_call_operand.vmem [shape: f32[2,8,1], index: 10, kind: output, shape index: {6}]  }
   0x1   :  { %1714 = sst [smem:[#allocation18_spill]] %s1697_s5 }
   0x2   :  { %1715 = sst [smem:[#allocation19_spill]] %s1698_s6 }
   0x3   :  { %16 = vsyncpa [#allocation3], 0 }
   0x4   :  { %18 = vsyncpa [#allocation3 + $0x1], 0 }
   0x5   :  { %19 = vsyncpa [#allocation5], 0 }
   0x6   :  { %21 = vsyncpa [#allocation5 + $0x1], 0  ;;  %s1406_s13 = smov 0   ;;  %s1408_s14 = smov 0  }
   0x7   :  { %s1410_s15 = smov 0   ;;  %s1412_s16 = smov 0  }
   0x8   :  { %s1414_s17 = smov 0   ;;  %s1416_s18 = smov 0  }
   0x9   :  { %s1418_s19 = smov 0   ;;  %s1420_s20 = smov 0  }
   0xa LB: > { %1716 = sst [smem:[#allocation8_spill]] %s1307_s13  ;;  %s1009_s21 = sadd.s32 4294967295, %s1335_s20   ;;  %s1335_s20 = sphi %s1420_s20, %s27_s20   ;;  %s1331_s19 = sphi %s1418_s19, %s1741_s19   ;;  %s1327_s18 = sphi %s1416_s18, %s1740_s18   ;;  %s1323_s17 = sphi %s1414_s17, %s1739_s17   ;;  %s1319_s16 = sphi %s1412_s16, %s1738_s16   ;;  %s1315_s15 = sphi %s1410_s15, %s1737_s15   ;;  %s1311_s14 = sphi %s1408_s14, %s1736_s14   ;;  %s1307_s13 = sphi %s1406_s13, %s1735_s13  }
   0xb   : > { %1717 = sst [smem:[#allocation9_spill]] %s1311_s14  ;;  %s36_s22 = sadd.s32 1, %s1327_s18 }
   0xc   : > { %1718 = sst [smem:[#allocation10_spill]] %s1315_s15  ;;  %s39_s23 = sadd.s32 1, %s1331_s19 }
   0xd   : > { %1719 = sst [smem:[#allocation11_spill]] %s1327_s18  ;;  %p37_p0 = scmp.ge.s32.totalorder %s36_s22, 2 }
   0xe   : > { %1720 = sst [smem:[#allocation12_spill]] %s1331_s19  ;;  %s1013_s24 = sshll.u32 %s1331_s19, 1 }
   0xf   : > { %1721 = sst [smem:[#allocation13_spill]] %s1335_s20  ;;  %s1010_s25 = sadd.s32 4294967294, %s1335_s20  }
  0x10   : > { %s137_s26 = sadd.s32 %s1327_s18, %s1013_s24  ;;  %s1743_s22 = smov (%p37_p0, %s36_s22), 0 }
  0x11   : > { %1722 = sst [smem:[#allocation14_spill]] %s1743_s22  ;;  %s1745_s23 = smov (!%p37_p0, %s39_s23), %s1331_s19 }
  0x12   : > { %p153_p1 = scmp.ne.s32.totalorder %s1315_s15, %s1311_s14  ;;  %p154_p2 = scmp.eq.s32.totalorder %s1009_s21, 3 }
  0x13   : > { %p41_p3 = scmp.ge.s32.totalorder %s1745_s23, 2  ;;  %p159_p4 = scmp.ne.s32.totalorder %s1311_s14, %s1307_s13 }
  0x14   : > { %p1459_p5 = por %p154_p2, %p153_p1  ;;  %p160_p6 = scmp.eq.s32.totalorder %s1010_s25, 3 }
  0x15   : > { %s1747_s23 = smov (%p41_p3, %s1745_s23), 0  ;;  %p1019_p8 = scmp.ge.s32.totalorder %s1335_s20, 1 }
  0x16   : > { %1724 = sst [smem:[#allocation15_spill]] %s1747_s23  ;;  %p1465_p7 = por %p160_p6, %p159_p4 }
  0x17   : > { %s1014_s29 = sshll.u32 %s1747_s23, 1  ;;  %p360_p9 = scmp.lt.s32.totalorder %s1335_s20, 5 }
  0x18   : > { %s1725_s28 = scalar_select %p1465_p7, 1, 0 }
  0x19   : > { %s139_s30 = sadd.s32 %s1014_s29, %s1743_s22  ;;  %s143_s11 = sadd.s32 1, %s1315_s15 }
  0x1a   : > { %1726 = sst [smem:[#allocation16_spill]] %s1725_s28  ;;  %s140_s12 = ssub.s32 %s137_s26, %s139_s30 }
  0x1b   : > { %p361_p10 = pnand %p1019_p8, %p360_p9  ;;  %p141_p11 = scmp.eq.s32.totalorder %s140_s12, 0 }
  0x1c   : > { %s1478_s24 = sand.u32 (!%p361_p10), 1, %s1311_s14   ;;  %s1022_s25 = sshll.u32 (!%p361_p10), %s1323_s17, 1 }
  0x1d   : > { %s1475_s21 = scalar_select %p141_p11, %s1315_s15, %s143_s11  }
  0x1e   : > { %364 = sbr.rel (%p361_p10) target bundleno = 738 (0x2e2), region = 36  ;;  %s1020_s19 = sshll.u32 (!%p361_p10), %s1478_s24, 3 }
  0x1f   : > { %1727 = sst [smem:[#allocation17_spill]] %s1475_s21  ;;  %s1483_s23 = sadd.s32 (!%p361_p10), %s1319_s16, %s1022_s25 }
  0x20   : > { %s1023_s29 = sshll.u32 (!%p361_p10), %s1483_s23, 4  ;;  %p439_p12 = scmp.lt.s32.totalorder (!%p361_p10), %s1323_s17, 1 }
  0x21   : > { %p428_p13 = scmp.lt.s32.totalorder (!%p361_p10), %s1023_s29, 63  ;;  %s1728_s6 = sld [smem:[#allocation19_spill]] (!%p361_p10) }
  0x22   : > { %s1518_s21 = scalar_lea.vmem (!%p361_p10), [#allocation2], %s1020_s19  ;;  %s1520_s14 = scalar_lea.vmem (!%p361_p10), [#allocation4], %s1020_s19 }
  0x23   : > { %s1749_s17 = smov (!%p439_p12, %s1323_s17), 1  ;;  %s1751_s29 = smov (!%p428_p13, %s1023_s29), 63 }
  0x24   : > { %s1025_s26 = sshll.u32 %s1749_s17, 3  ;;  %s1024_s30 = sshll.u32 %s1751_s29, 3 }
  0x25   : > { %s1496_s15 = scalar_lea.vmem %s1693_s1, %s1024_s30  ;;  %s1501_s28 = scalar_lea.vmem %s1699_s7, %s1025_s26 }
  0x26   : > { %s1506_s17 = scalar_lea.vmem %s1700_s8, %s1025_s26  ;;  %s1511_s11 = scalar_lea.vmem %s1701_s9, %s1025_s26 }
  0x27   : > { %s1491_s22 = scalar_lea.vmem %s1728_s6, %s1025_s26  ;;  %s1516_s18 = scalar_lea.vmem %s1702_s10, %s1025_s26 }
  0x28   : > { %p1030_p0 = scmp.ne.s32.totalorder %s1319_s16, 0 }
  0x2a   : > { %462 = sbr.rel (%p1030_p0) target bundleno = 51 (0x33), region = 40 }
  0x2f   : > { %vm463_vm0 = vcmask 7168   ;;  %v1337_v0 = vmov -inf   ;;  %v1338_v1 = vmov 0.0  }
  0x30   : > { %464 = vst.msk [vmem:[%s1491_s22] sm:$0xff] %vm463_vm0, %v1337_v0  ;;  %465 = vst.msk [vmem:[%s1501_s28] sm:$0xff] %vm463_vm0, %v1338_v1 }
  0x31   : > { %466 = vst.msk [vmem:[%s1506_s17] sm:$0xff] %vm463_vm0, %v1338_v1  ;;  %467 = vst.msk [vmem:[%s1511_s11] sm:$0xff] %vm463_vm0, %v1338_v1 }
  0x32   : > { %468 = vst.msk [vmem:[%s1516_s18] sm:$0xff] %vm463_vm0, %v1338_v1 }
  0x33 PF: > { %v488_v2 = vld [vmem:[%s1496_s15 + $0x78] sm:$0xff]  ;;  %vm499_vm1 = vcmask 261120   ;;  %v1339_v3 = vmov 0.0   ;;  %vm1340_vm2 = vmmov 0   ;;  %s1532_s5 = sshll.u32 %s1483_s23, 7  ;;  %v1341_v4 = vmov 0  }
  0x34   : > { %1077 = vmatprep.subr.mxu0 %v1339_v3  ;;  %1109 = vmatprep.mubr.msk.f32.mxu0 %vm1340_vm2, %v1339_v3  ;;  %v487_v5 = vld [vmem:[%s1496_s15 + $0x70] sm:$0xff]  ;;  %v622_v6 = vstv %s1532_s5  ;;  %v621_v7 = vld [vmem:[%s1695_s3] sm:$0xff]  ;;  %v486_v9 = vld [vmem:[%s1496_s15 + $0x68] sm:$0xff]  ;;  %v1342_v11 = vmov 1   ;;  %v1343_v13 = vmov 2   ;;  %v1344_v15 = vmov 3   ;;  %s750_s12 = scalar_lea.hbm %s1696_s4, %s1532_s5 }
  0x35   : > { %1078 = vmatpush3.xpose.msk.msra.mxu0 %vm499_vm1, %v488_v2  ;;  %1201 = vset.pattern.permute.xlu1 %v1341_v4  ;;  %v623_v8 = vsub.s32 %v621_v7, %v622_v6  ;;  %v485_v10 = vld [vmem:[%s1496_s15 + $0x60] sm:$0xff]  ;;  %v484_v12 = vld [vmem:[%s1496_s15 + $0x58] sm:$0xff]  ;;  %v483_v14 = vld [vmem:[%s1496_s15 + $0x50] sm:$0xff]  ;;  %v1345_v18 = vmov 4   ;;  %v1346_v20 = vmov 5   ;;  %v1347_v22 = vmov 6  }
  0x36   : > { %1079 = vmatprep.subr.mxu0 %v1339_v3  ;;  %1200 = vset.pattern.permute.xlu0 %v1341_v4  ;;  %v482_v16 = vld [vmem:[%s1496_s15 + $0x48] sm:$0xff]  ;;  %v481_v17 = vld [vmem:[%s1496_s15 + $0x40] sm:$0xff]  ;;  %v480_v19 = vld [vmem:[%s1496_s15 + $0x38] sm:$0xff]  ;;  %v1348_v24 = vmov 7   ;;  %s489_s20 = sshra.s32 %s1532_s5, 7  ;;  %v624_v39 = vlaneseq  ;;  %vm689_vm2 = vcmask 7168  }
  0x37   : > { %627 = vperm.xlu1 %1201, %v623_v8   ;;  %v479_v21 = vld [vmem:[%s1496_s15 + $0x30] sm:$0xff]  ;;  %v478_v23 = vld [vmem:[%s1496_s15 + $0x28] sm:$0xff]  ;;  %v477_v25 = vld [vmem:[%s1496_s15 + $0x20] sm:$0xff]  ;;  %s491_s30 = scalar_lea.vmem %s1694_s2, %s489_s20  ;;  %s1349_s13 = smov [#allocation2]  }
  0x38   : > { %v476_v26 = vld [vmem:[%s1496_s15 + $0x18] sm:$0xff]  ;;  %v475_v27 = vld [vmem:[%s1496_s15 + $0x10] sm:$0xff]  ;;  %v474_v28 = vld [vmem:[%s1496_s15 + $0x8] sm:$0xff]  ;;  %v625_v40 = vand.u32 127, %v624_v39  ;;  %s1217_s16 = sshll.u32 %s1349_s13, 4  ;;  %s1218_s16 = int_to_ptr.vmem [resolvable:$false] %s1217_s16 }
  0x39   : > { %1080 = vmatpush3.xpose.msk.msra.mxu0 %vm499_vm1, %v487_v5  ;;  %v473_v29 = vld [vmem:[%s1496_s15] sm:$0xff]  ;;  %s752_s15 = sshll.u32 %s1518_s21, 4  ;;  %s1219_s19 = scalar_lea.vmem %s1218_s16, 256  ;;  %s753_s15 = int_to_ptr.vmem [resolvable:$true] %s752_s15 }
  0x3a   : > { %1081 = vmatprep.subr.mxu0 %v1339_v3  ;;  %v472_v30 = vld [vmem:[%s1692_s0] sm:$0xff]  ;;  %v703_v57 = vadd.s32 %v625_v40, %v622_v6  ;;  %s1213_s6 = scalar_lea.vmem %s753_s15, 128  ;;  %p1220_p4 = scmp.lt.s32.totalorder %s753_s15, %s1218_s16 }
  0x3b   : > { %1202 = vset.pattern.permute.xlu1 %v1342_v11  ;;  %v1033_v32 = vld [vmem:[%s491_s30] ss:$0 sm:$0xff]  ;;  %p1214_p1 = scmp.ne.s32.totalorder %s753_s15, %s1213_s6  ;;  %p1221_p6 = scmp.lt.s32.totalorder %s1219_s19, %s1213_s6 }
  0x3c   : > { %631 = vperm.xlu1 %1202, %v623_v8   ;;  %v1598_v46 = vld [vmem:[%s1491_s22] sm:$0xff] }
  0x3d   : > { %1082 = vmatpush3.xpose.msk.msra.mxu0 %vm499_vm1, %v486_v9  ;;  %v698_v51 = vld [vmem:[%s1516_s18] sm:$0xff]  ;;  %p1215_p2 = pnand %p1214_p1, %p1459_p5  ;;  %p1222_p8 = por %p1221_p6, %p1220_p4 }
  0x3e   : > { %1083 = vmatprep.subr.mxu0 %v1339_v3 }
  0x3f   : > { %p1216_p3 = pneg %p1215_p2 }
  0x40   : > { %1203 = vset.pattern.permute.xlu1 %v1343_v13 }
  0x41   : > { %1084 = vmatpush3.xpose.msk.msra.mxu0 %vm499_vm1, %v485_v10  ;;  %636 = vperm.xlu1 %1203, %v623_v8   ;;  %p1223_p9 = pnand %p1222_p8, %p1216_p3 }
  0x42   : > { %1085 = vmatprep.subr.mxu0 %v1339_v3 }
  0x45   : > { %1086 = vmatpush3.xpose.msk.msra.mxu0 %vm499_vm1, %v484_v12  ;;  %1204 = vset.pattern.permute.xlu1 %v1344_v15 }
  0x46   : > { %1087 = vmatprep.subr.mxu0 %v1339_v3  ;;  %641 = vperm.xlu1 %1204, %v623_v8  }
  0x49   : > { %1088 = vmatpush3.xpose.msk.msra.mxu0 %vm499_vm1, %v483_v14 }
  0x4a   : > { %1089 = vmatprep.subr.mxu0 %v1339_v3  ;;  %1205 = vset.pattern.permute.xlu1 %v1345_v18 }
  0x4b   : > { %646 = vperm.xlu1 %1205, %v623_v8  }
  0x4d   : > { %1090 = vmatpush3.xpose.msk.msra.mxu0 %vm499_vm1, %v482_v16 }
  0x4e   : > { %1091 = vmatprep.subr.mxu0 %v1339_v3 }
  0x4f   : > { %1206 = vset.pattern.permute.xlu1 %v1346_v20 }
  0x50   : > { %651 = vperm.xlu1 %1206, %v623_v8  }
  0x51   : > { %1092 = vmatpush3.xpose.msk.msra.mxu0 %vm499_vm1, %v481_v17 }
  0x52   : > { %1093 = vmatprep.subr.mxu0 %v1339_v3 }
  0x54   : > { %1207 = vset.pattern.permute.xlu1 %v1347_v22 }
  0x55   : > { %1094 = vmatpush3.xpose.msk.msra.mxu0 %vm499_vm1, %v480_v19  ;;  %656 = vperm.xlu1 %1207, %v623_v8  }
  0x56   : > { %1095 = vmatprep.subr.mxu0 %v1339_v3 }
  0x59   : > { %1096 = vmatpush3.xpose.msk.msra.mxu0 %vm499_vm1, %v479_v21  ;;  %1208 = vset.pattern.permute.xlu1 %v1348_v24 }
  0x5a   : > { %1097 = vmatprep.subr.mxu0 %v1339_v3  ;;  %661 = vperm.xlu1 %1208, %v623_v8  }
  0x5d   : > { %1098 = vmatpush3.xpose.msk.msra.mxu0 %vm499_vm1, %v478_v23 }
  0x5e   : > { %1099 = vmatprep.subr.mxu0 %v1339_v3 }
  0x61   : > { %1100 = vmatpush3.xpose.msk.msra.mxu0 %vm499_vm1, %v477_v25 }
  0x62   : > { %1101 = vmatprep.subr.mxu0 %v1339_v3 }
  0x65   : > { %1102 = vmatpush3.xpose.msk.msra.mxu0 %vm499_vm1, %v476_v26 }
  0x66   : > { %1103 = vmatprep.subr.mxu0 %v1339_v3 }
  0x69   : > { %1104 = vmatpush3.xpose.msk.msra.mxu0 %vm499_vm1, %v475_v27 }
  0x6a   : > { %1105 = vmatprep.subr.mxu0 %v1339_v3 }
  0x6d   : > { %1106 = vmatpush3.xpose.msk.msra.mxu0 %vm499_vm1, %v474_v28 }
  0x6e   : > { %1107 = vmatprep.subr.mxu0 %v1339_v3 }
  0x71   : > { %1108 = vmatpush3.xpose.msk.msra.mxu0 %vm499_vm1, %v473_v29 }
  0x74   : > { %1110 = vmatmul.mubr.msk.f32.vlgmr.msra.gmra.mxu0 %vm499_vm1, %v472_v30 }
  0xb2   : > { %v628_v31 = vpop.permute.xlu1 %627 }
  0xb3   : > { %vm629_vm3 = vcmp.eq.s32.totalorder %v628_v31, %v625_v40 }
  0xb7   : > { %v632_v36 = vpop.permute.xlu1 %631 }
  0xb8   : > { %vm633_vm4 = vcmp.eq.s32.totalorder %v632_v36, %v625_v40 }
  0xb9   : > { %vm634_vm5 = vmor %vm629_vm3, %vm633_vm4  ;;  %vm704_vm3 = vcmp.lt.s32.totalorder %v703_v57, 300 }
  0xbc   : > { %v637_v37 = vpop.permute.xlu1 %636 }
  0xbd   : > { %vm638_vm6 = vcmp.eq.s32.totalorder %v637_v37, %v625_v40 }
  0xbe   : > { %vm639_vm7 = vmor %vm634_vm5, %vm638_vm6 }
  0xc1   : > { %v642_v38 = vpop.permute.xlu1 %641 }
  0xc2   : > { %vm643_vm8 = vcmp.eq.s32.totalorder %v642_v38, %v625_v40 }
  0xc3   : > { %vm644_vm9 = vmor %vm639_vm7, %vm643_vm8 }
  0xc6   : > { %v647_v41 = vpop.permute.xlu1 %646 }
  0xc7   : > { %vm648_vm10 = vcmp.eq.s32.totalorder %v647_v41, %v625_v40 }
  0xc8   : > { %vm649_vm11 = vmor %vm644_vm9, %vm648_vm10 }
  0xcb   : > { %v652_v42 = vpop.permute.xlu1 %651 }
  0xcc   : > { %vm653_vm12 = vcmp.eq.s32.totalorder %v652_v42, %v625_v40 }
  0xcd   : > { %vm654_vm13 = vmor %vm649_vm11, %vm653_vm12 }
  0xd0   : > { %v657_v43 = vpop.permute.xlu1 %656 }
  0xd1   : > { %vm658_vm14 = vcmp.eq.s32.totalorder %v657_v43, %v625_v40 }
  0xd2   : > { %vm659_vm15 = vmor %vm654_vm13, %vm658_vm14 }
  0xd5   : > { %v662_v44 = vpop.permute.xlu1 %661 }
  0xd6   : > { %vm663_vm0 = vcmp.eq.s32.totalorder %v662_v44, %v625_v40 }
  0xd7   : > { %vm664_vm1 = vmor %vm659_vm15, %vm663_vm0 }
  0xd8   : > { %v1051_v45 = vsel %vm664_vm1, 1.0, %v1339_v3 }
  0xd9   : > { %699 = vadd.xlane.f32.xlu1 %v1051_v45  ;;  %667 = vst [vmem:[%s1520_s14] sm:$0xff] %v1051_v45 }
 0x134   : > { %v617_v33 = vpop.f32.mrf.mxu0 }
 0x135   : > { %v618_v34 = vadd.f32 %v1033_v32, %v617_v33 }
 0x136   : > { %v1111_v35 = vpop.f32.mrf.mxu0 }
 0x137   : > { %668 = vst [vmem:[%s1518_s21] sm:$0xff] %v618_v34  ;;  %670 = vmax.xlane.f32.xlu0 %v618_v34  ;;  %v693_v50 = vsel %vm664_vm1, %v618_v34, 0.0  ;;  %v705_v59 = vsel %vm704_vm3, %v618_v34, 0.0 }
 0x162   : > { %v700_v52 = vpop.xlane.xlu1 %699 }
 0x163   : > { %v701_v53 = vadd.f32 %v700_v52, %v698_v51 }
 0x165   : > { %702 = vst.msk [vmem:[%s1516_s18] sm:$0xff] %vm689_vm2, %v701_v53  ;;  %s712_s18 = scalar_lea.sflag [#allocation3], %s1478_s24 }
 0x1c0   : > { %v671_v47 = vpop.xlane.xlu0 %670 }
 0x1c1   : > { %v1601_v48 = vmax.f32 %v1598_v46, %v671_v47 }
 0x1c3   : > { %v674_v49 = vsub.f32 %v1598_v46, %v1601_v48  ;;  %691 = vst.msk [vmem:[%s1491_s22] sm:$0xff] %vm689_vm2, %v1601_v48  ;;  %680 = vperm.xlu0 %1200, %v1601_v48  }
 0x1e2   : > { %694 = vadd.xlane.f32.xlu0 %v693_v50 }
 0x23e   : > { %v681_v54 = vpop.permute.xlu0 %680 }
 0x23f   : > { %v683_v55 = vsub.f32 %v618_v34, %v681_v54 }
 0x241   : > { %v684_v56 = vmul.f32 1.442695, %v683_v55 }
 0x243   : > { %1209 = vpow2.f32 %v684_v56 }
 0x250   : > { %v1210_v58 = vpop.eup %1209 }
 0x251   : > { %686 = vadd.xlane.f32.xlu1 %v1210_v58 }
 0x255   : > { %707 = vadd.xlane.f32.xlu1 %v705_v59 }
 0x256   : > { %1226 = shalt.err (!%p1223_p9)
}
 0x257   : > { %s1227_s21 = scalar_lea.hbm %s750_s12, 128  ;;  %s1231_s26 = scalar_lea.hbm %s1696_s4, 512 }
 0x258   : > { %p1228_p10 = scmp.ne.s32.totalorder %s750_s12, %s1227_s21  ;;  %p1232_p13 = scmp.lt.s32.totalorder %s750_s12, %s1696_s4 }
 0x259   : > { %p1233_p0 = scmp.lt.s32.totalorder %s1231_s26, %s1227_s21 }
 0x25a   : > { %p1229_p11 = pnand %p1228_p10, %p1459_p5 }
 0x25b   : > { %p1234_p1 = por %p1233_p0, %p1232_p13 }
 0x25c   : > { %p1230_p12 = pneg %p1229_p11 }
 0x25e   : > { %p1235_p2 = pnand %p1234_p1, %p1230_p12 }
 0x260   : > { %1238 = shalt.err (!%p1235_p2)
}
 0x261   : > { %1112 = dma.vmem_to_hbm [thread:$0]  (%p1459_p5), %s753_s15, 128, %s750_s12, %s712_s18  }
 0x262   : > { %s1729_s13 = sld [smem:[#allocation18_spill]]  ;;  %s1731_s19 = sshll.u32 %s1520_s14, 4  ;;  %s768_s19 = int_to_ptr.vmem [resolvable:$true] %s1731_s19 }
 0x263   : > { %s717_s20 = scalar_lea.sflag [#allocation5], %s1478_s24  ;;  %s1239_s23 = scalar_lea.vmem %s768_s19, 128 }
 0x264   : > { %p1240_p3 = scmp.ne.s32.totalorder %s768_s19, %s1239_s23  ;;  %s1350_s21 = smov [#allocation4]  }
 0x265   : > { %s1243_s26 = sshll.u32 %s1350_s21, 4  ;;  %s1244_s26 = int_to_ptr.vmem [resolvable:$false] %s1243_s26 }
 0x266   : > { %p1241_p4 = pnand %p1240_p3, %p1459_p5  ;;  %s1245_s30 = scalar_lea.vmem %s1244_s26, 256 }
 0x267   : > { %p1246_p8 = scmp.lt.s32.totalorder %s768_s19, %s1244_s26  ;;  %p1247_p9 = scmp.lt.s32.totalorder %s1245_s30, %s1239_s23 }
 0x268   : > { %s1730_s22 = smov %s1729_s13  ;;  %s765_s16 = scalar_lea.hbm %s1729_s13, %s1532_s5 }
 0x269   : > { %p1242_p6 = pneg %p1241_p4  ;;  %p1248_p10 = por %p1247_p9, %p1246_p8 }
 0x26b   : > { %p1249_p11 = pnand %p1248_p10, %p1242_p6 }
 0x26d   : > { %1252 = shalt.err (!%p1249_p11)
}
 0x26e   : > { %s1253_s15 = scalar_lea.hbm %s765_s16, 128  ;;  %s1257_s5 = scalar_lea.hbm %s1730_s22, 512 }
 0x26f   : > { %p1254_p12 = scmp.ne.s32.totalorder %s765_s16, %s1253_s15  ;;  %p1258_p1 = scmp.lt.s32.totalorder %s765_s16, %s1730_s22 }
 0x270   : > { %p1259_p2 = scmp.lt.s32.totalorder %s1257_s5, %s1253_s15 }
 0x271   : > { %p1255_p13 = pnand %p1254_p12, %p1459_p5 }
 0x272   : > { %p1260_p3 = por %p1259_p2, %p1258_p1 }
 0x273   : > { %p1256_p0 = pneg %p1255_p13 }
 0x275   : > { %p1261_p4 = pnand %p1260_p3, %p1256_p0 }
 0x277   : > { %1264 = shalt.err (!%p1261_p4)
}
 0x278   : > { %1113 = dma.vmem_to_hbm [thread:$0]  (%p1459_p5), %s768_s19, 128, %s765_s16, %s717_s20   ;;  %v692_v60 = vld [vmem:[%s1506_s17] sm:$0xff]  ;;  %v695_v61 = vpop.xlane.xlu0 %694  ;;  %v675_v63 = vmul.f32 1.442695, %v674_v49 }
 0x279   : > { %v696_v62 = vadd.f32 %v695_v61, %v692_v60  ;;  %v673_v1 = vld [vmem:[%s1501_s28] sm:$0xff] }
 0x27a   : > { %1211 = vpow2.f32 %v675_v63  ;;  %v706_v5 = vld [vmem:[%s1511_s11] sm:$0xff] }
 0x27b   : > { %697 = vst.msk [vmem:[%s1506_s17] sm:$0xff] %vm689_vm2, %v696_v62 }
 0x287   : > { %v1212_v0 = vpop.eup %1211 }
 0x288   : > { %v677_v2 = vmul.f32 %v1212_v0, %v673_v1 }
 0x2da   : > { %v687_v3 = vpop.xlane.xlu1 %686 }
 0x2db   : > { %v688_v4 = vadd.f32 %v687_v3, %v677_v2 }
 0x2dd   : > { %690 = vst.msk [vmem:[%s1501_s28] sm:$0xff] %vm689_vm2, %v688_v4 }
 0x2de   : > { %v708_v6 = vpop.xlane.xlu1 %707 }
 0x2df   : > { %v709_v7 = vadd.f32 %v708_v6, %v706_v5 }
 0x2e1   : > { %710 = vst.msk [vmem:[%s1511_s11] sm:$0xff] %vm689_vm2, %v709_v7 }
 0x2e2 PF: > { %s1732_s27 = sld [smem:[#allocation13_spill]] }
 0x2e3   : > { %s1733_s17 = sld [smem:[#allocation8_spill]] }
 0x2e8   : > { %p1123_p5 = scmp.ge.s32.totalorder %s1732_s27, 2 }
 0x2e9   : > { %s794_s29 = sand.u32 1, %s1733_s17  }
 0x2ea   : > { %p1117_p6 = pnand %p1123_p5, %p1465_p7  ;;  %s795_s6 = scalar_lea.sflag [#allocation3], %s794_s29 }
 0x2ec   : > { %p1118_p8 = pneg %p1117_p6 }
 0x2ee   : > { %1298 = dma.done.wait (%p1118_p8), %s795_s6, 128  }
 0x2ef   : > { %1300 = vsyncadd (%p1118_p8), %s795_s6, 4294967168  ;;  %s804_s13 = scalar_lea.sflag [#allocation5], %s794_s29 }
 0x2f0   : > { %1302 = dma.done.wait (%p1118_p8), %s804_s13, 128  }
 0x2f1   : > { %1304 = vsyncadd (%p1118_p8), %s804_s13, 4294967168  ;;  %s27_s20 = sadd.s32 1, %s1732_s27   ;;  %s1735_s13 = sld [smem:[#allocation9_spill]] }
 0x2f2   : > { %p24_p9 = scmp.ge.s32.totalorder %s27_s20, 6   ;;  %s1736_s14 = sld [smem:[#allocation10_spill]] }
 0x2f3   : > { %s1737_s15 = sld [smem:[#allocation17_spill]] }
 0x2f4   : > { %s1738_s16 = sld [smem:[#allocation11_spill]]  ;;  %26 = sbr.rel (!%p24_p9) target bundleno = 10 (0xa), region = 153 }
 0x2f5   : > { %s1739_s17 = sld [smem:[#allocation12_spill]] }
 0x2f6   : > { %s1740_s18 = sld [smem:[#allocation14_spill]] }
 0x2f7   : > { %s1741_s19 = sld [smem:[#allocation15_spill]] }
 0x2f9   :  { %844 = vsyncpa [#allocation3], 1 }
 0x2fa   :  { %846 = vsyncpa [#allocation3 + $0x1], 1 }
 0x2fb   :  { %847 = vsyncpa [#allocation5], 1 }
 0x2fc   :  { %849 = vsyncpa [#allocation5 + $0x1], 1 }

</bundles_post_ra>
